<compile_context>
chip_gen: v7x
topology: tpu7x:2x2x1
jax: 0.10.0
libtpu: 0.0.40
codegen_flags: <defaults>
</compile_context>

<pallas_src>
import jax
import jax.numpy as jnp
from jax.experimental import pallas as pl
from jax.experimental.pallas import tpu as pltpu


def _round_up(a: int, b: int) -> int:
    return (a + b - 1) // b * b


def wrap_model_kernel(x_ref, w_eff_ref, b_eff_ref, w2_ref, b2_ref, out_ref):
    # x_ref     : (TILE_N, C*HW) f32 VMEM  (batch tile, pipelined)
    # w_eff_ref : (C*HW, H1)     f32 VMEM  (resident; pool+norm+layer1 folded in)
    # b_eff_ref : (1, H1)        f32 VMEM  (resident)
    # w2_ref    : (H1, K)        f32 VMEM  (resident)
    # b2_ref    : (1, K)         f32 VMEM  (resident)
    # out_ref   : (TILE_N, K)    f32 VMEM
    h = jnp.maximum(
        jnp.dot(x_ref[...], w_eff_ref[...], preferred_element_type=jnp.float32)
        + b_eff_ref[...],
        0.0,
    )
    out_ref[...] = (
        jnp.dot(h, w2_ref[...], preferred_element_type=jnp.float32) + b2_ref[...]
    ).astype(out_ref.dtype)


def wrap_model_forward(x_nchw, mean, std, w1, b1, w2, b2, *, tile_n=None):
    """x_nchw: (N, 3, H, W) f32.  Returns logits (N, K) f32."""
    n, c, h, w = x_nchw.shape
    hw = h * w
    chw = c * hw
    h1 = w1.shape[1]
    k = w2.shape[1]

    # Sublane-dense glue reshape: NCHW -> (N, C*HW); contiguous, no data movement.
    x2d = x_nchw.reshape(n, chw).astype(jnp.float32)

    # Fold pool + (x - mean) * inv_std + layer 1 into one affine (exact by
    # linearity of the average pool); inv_std precomputed -> multiply, not divide.
    inv_std = (1.0 / std.astype(jnp.float32)).reshape(c)
    mean_f = mean.astype(jnp.float32).reshape(c)
    w1f = w1.astype(jnp.float32)
    w_eff = jnp.repeat(w1f * (inv_std / float(hw))[:, None], hw, axis=0)  # (CHW, H1)
    b_eff = b1.astype(jnp.float32).reshape(1, h1) - ((mean_f * inv_std) @ w1f).reshape(1, h1)
    w2f = w2.astype(jnp.float32)
    b2f = b2.astype(jnp.float32).reshape(1, k)

    weight_bytes = 4 * (w_eff.size + b_eff.size + w2f.size + b2f.size)

    # Pad the batch only to a sublane multiple of 8 (NOT to tile_n).
    n_pad = _round_up(n, 8)
    if n_pad != n:
        x2d = jnp.pad(x2d, ((0, n_pad - n), (0, 0)))

    # Generation-aware VMEM ceiling (<= 64 MiB so v7x's smaller VMEM is safe).
    try:
        phys_vmem = int(pltpu.get_tpu_info().vmem_capacity_bytes)
    except Exception:
        phys_vmem = 128 * 1024 * 1024
    ceiling = min(64 * 1024 * 1024, max(16 * 1024 * 1024, int(phys_vmem * 0.55)))

    # Batch tile: as large as the x-buffer budget allows (amortize per-step
    # overhead), but keep >= 2 grid steps when the batch allows it so pipelining
    # and 2-TC sharding engage, and only use tiles that divide n_pad exactly.
    if tile_n is None:
        x_buf_budget = max(1 << 20, min(12 << 20, (ceiling - weight_bytes) // 3))
        budget_rows = max(8, x_buf_budget // (chw * 4))
        cap = max(8, (budget_rows // 8) * 8)
    else:
        cap = max(8, (int(tile_n) // 8) * 8)
    if n_pad >= 16:
        cap = min(cap, max(8, (n_pad // 2 // 8) * 8))

    m = n_pad // 8
    best = 1
    for d in range(1, m + 1):
        if m % d == 0 and 8 * d <= cap:
            best = d
    tile_n = 8 * best
    num_steps = n_pad // tile_n

    x_block_bytes = tile_n * chw * 4
    out_block_bytes = tile_n * k * 4
    needed = 2 * (x_block_bytes + out_block_bytes) + weight_bytes
    vmem_limit = int(min(ceiling, max(16 * 1024 * 1024, int(needed * 1.3))))

    out = pl.pallas_call(
        wrap_model_kernel,
        out_shape=jax.ShapeDtypeStruct((n_pad, k), jnp.float32),
        grid=(num_steps,),
        in_specs=[
            pl.BlockSpec((tile_n, chw), lambda i: (i, 0)),  # x (pipelined)
            pl.BlockSpec((chw, h1), lambda i: (0, 0)),      # W_eff (resident)
            pl.BlockSpec((1, h1), lambda i: (0, 0)),        # b_eff
            pl.BlockSpec((h1, k), lambda i: (0, 0)),        # w2
            pl.BlockSpec((1, k), lambda i: (0, 0)),         # b2
        ],
        out_specs=pl.BlockSpec((tile_n, k), lambda i: (i, 0)),
        compiler_params=pltpu.CompilerParams(
            dimension_semantics=("parallel",),
            vmem_limit_bytes=vmem_limit,
        ),
    )(x2d, w_eff, b_eff, w2f, b2f)
    return out[:n, :k]


if __name__ == "__main__":
    # Small shapes consistent with the module: batch=2, channels=3 (required by
    # the 3-entry mean/std), spatial=16x16, hidden=32, classes=8.
    N, C, H, W = 2, 3, 16, 16
    HIDDEN, CLASSES = 32, 8

    key = jax.random.PRNGKey(0)
    kx, kw1, kb1, kw2, kb2 = jax.random.split(key, 5)

    x = jax.random.uniform(kx, (N, C, H, W), dtype=jnp.float32)  # image-like [0,1)

    mean = jnp.array([0.485, 0.456, 0.406], dtype=jnp.float32)
    std = jnp.array([0.229, 0.224, 0.225], dtype=jnp.float32)

    # Deterministic synthetic inner-model parameters.
    # TODO(synk): the original inner `model` is arbitrary; this pool->MLP head
    # stands in for it (the normalize-then-model contract is what is kernelized).
    w1 = jax.random.normal(kw1, (C, HIDDEN), dtype=jnp.float32) * 0.1
    b1 = jax.random.normal(kb1, (1, HIDDEN), dtype=jnp.float32) * 0.01
    w2 = jax.random.normal(kw2, (HIDDEN, CLASSES), dtype=jnp.float32) * 0.1
    b2 = jax.random.normal(kb2, (1, CLASSES), dtype=jnp.float32) * 0.01

    out = wrap_model_forward(x, mean, std, w1, b1, w2, b2)
    out = jax.block_until_ready(out)

    # Pure-JAX reference following the original PyTorch formulation (divide,
    # normalize every pixel before the model).
    x_norm_ref = (x - mean.reshape(1, C, 1, 1)) / std.reshape(1, C, 1, 1)
    pooled_ref = x_norm_ref.mean(axis=(2, 3))
    h_ref = jnp.maximum(pooled_ref @ w1 + b1, 0.0)
    ref = h_ref @ w2 + b2

    assert out.shape == (N, CLASSES)
    assert jnp.allclose(out, ref, atol=3e-5, rtol=1e-4), "mismatch vs reference"
    print("KERNEL_OK")
</pallas_src>

<mosaic_0001>
module attributes {stable_mosaic.version = 11 : i64} {
  func.func @wrap_model_kernel(%arg0: i32, %arg1: memref<8x768xf32, #tpu.memory_space<vmem>>, %arg2: memref<768x32xf32, #tpu.memory_space<vmem>>, %arg3: memref<1x32xf32, #tpu.memory_space<vmem>>, %arg4: memref<32x8xf32, #tpu.memory_space<vmem>>, %arg5: memref<1x8xf32, #tpu.memory_space<vmem>>, %arg6: memref<8x8xf32, #tpu.memory_space<vmem>>) attributes {dimension_semantics = [#tpu.dimension_semantics<parallel>], iteration_bounds = array<i64: 1>, scalar_prefetch = 0 : i64, scratch_operands = 0 : i64, tpu.core_type = #tpu.core_type<tc>, window_params = [{transform_indices = @transform_0, window_bounds = array<i64: 8, 768>}, {pipeline_mode = #tpu.pipeline_mode<synchronous>, transform_indices = @transform_1, window_bounds = array<i64: 768, 32>}, {pipeline_mode = #tpu.pipeline_mode<synchronous>, transform_indices = @transform_2, window_bounds = array<i64: 1, 32>}, {pipeline_mode = #tpu.pipeline_mode<synchronous>, transform_indices = @transform_3, window_bounds = array<i64: 32, 8>}, {pipeline_mode = #tpu.pipeline_mode<synchronous>, transform_indices = @transform_4, window_bounds = array<i64: 1, 8>}, {transform_indices = @transform_5, window_bounds = array<i64: 8, 8>}]} {
    %c0 = arith.constant 0 : index
    %c0_0 = arith.constant 0 : index
    %0 = vector.load %arg1[%c0, %c0_0] : memref<8x768xf32, #tpu.memory_space<vmem>>, vector<8x768xf32>
    %c0_1 = arith.constant 0 : index
    %c0_2 = arith.constant 0 : index
    %1 = vector.load %arg2[%c0_1, %c0_2] : memref<768x32xf32, #tpu.memory_space<vmem>>, vector<768x32xf32>
    %cst = arith.constant dense<0.000000e+00> : vector<8x32xf32>
    %2 = tpu.matmul %0, %1, %cst {dimension_numbers = #tpu.dot_dimension_numbers<[1], [0], [0], [1], [0, 0, 1, 1], [], []>} : vector<8x768xf32>, vector<768x32xf32>, vector<8x32xf32> -> vector<8x32xf32>
    %c0_3 = arith.constant 0 : index
    %c0_4 = arith.constant 0 : index
    %3 = vector.load %arg3[%c0_3, %c0_4] : memref<1x32xf32, #tpu.memory_space<vmem>>, vector<1x32xf32>
    %4 = vector.broadcast %3 : vector<1x32xf32> to vector<8x32xf32>
    %5 = arith.addf %2, %4 : vector<8x32xf32>
    %cst_5 = arith.constant 0.000000e+00 : f32
    %6 = vector.broadcast %cst_5 : f32 to vector<8x32xf32>
    %7 = arith.maximumf %5, %6 : vector<8x32xf32>
    %c0_6 = arith.constant 0 : index
    %c0_7 = arith.constant 0 : index
    %8 = vector.load %arg4[%c0_6, %c0_7] : memref<32x8xf32, #tpu.memory_space<vmem>>, vector<32x8xf32>
    %cst_8 = arith.constant dense<0.000000e+00> : vector<8x8xf32>
    %9 = tpu.matmul %7, %8, %cst_8 {dimension_numbers = #tpu.dot_dimension_numbers<[1], [0], [0], [1], [0, 0, 1, 1], [], []>} : vector<8x32xf32>, vector<32x8xf32>, vector<8x8xf32> -> vector<8x8xf32>
    %c0_9 = arith.constant 0 : index
    %c0_10 = arith.constant 0 : index
    %10 = vector.load %arg5[%c0_9, %c0_10] : memref<1x8xf32, #tpu.memory_space<vmem>>, vector<1x8xf32>
    %11 = vector.broadcast %10 : vector<1x8xf32> to vector<8x8xf32>
    %12 = arith.addf %9, %11 : vector<8x8xf32>
    %c0_11 = arith.constant 0 : index
    %c0_12 = arith.constant 0 : index
    %13 = vector.load %arg6[%c0_11, %c0_12] : memref<8x8xf32, #tpu.memory_space<vmem>>, vector<8x8xf32>
    tpu.vector_store %arg6[%c0_11, %c0_12], %12 {strides = array<i32>} : memref<8x8xf32, #tpu.memory_space<vmem>>, vector<8x8xf32>,
    return
  }
  func.func @transform_0(%arg0: i32) -> (i32, i32) {
    %c0_i32 = arith.constant 0 : i32
    %c0_i32_0 = arith.constant 0 : i32
    return %arg0, %c0_i32 : i32, i32
  }
  func.func @transform_1(%arg0: i32) -> (i32, i32) {
    %c0_i32 = arith.constant 0 : i32
    %c0_i32_0 = arith.constant 0 : i32
    %c0_i32_1 = arith.constant 0 : i32
    return %c0_i32, %c0_i32_0 : i32, i32
  }
  func.func @transform_2(%arg0: i32) -> (i32, i32) {
    %c0_i32 = arith.constant 0 : i32
    %c0_i32_0 = arith.constant 0 : i32
    %c0_i32_1 = arith.constant 0 : i32
    return %c0_i32, %c0_i32_0 : i32, i32
  }
  func.func @transform_3(%arg0: i32) -> (i32, i32) {
    %c0_i32 = arith.constant 0 : i32
    %c0_i32_0 = arith.constant 0 : i32
    %c0_i32_1 = arith.constant 0 : i32
    return %c0_i32, %c0_i32_0 : i32, i32
  }
  func.func @transform_4(%arg0: i32) -> (i32, i32) {
    %c0_i32 = arith.constant 0 : i32
    %c0_i32_0 = arith.constant 0 : i32
    %c0_i32_1 = arith.constant 0 : i32
    return %c0_i32, %c0_i32_0 : i32, i32
  }
  func.func @transform_5(%arg0: i32) -> (i32, i32) {
    %c0_i32 = arith.constant 0 : i32
    %c0_i32_0 = arith.constant 0 : i32
    return %arg0, %c0_i32 : i32, i32
  }
}

</mosaic_0001>

<bundles_post_ra>
// kernel: tpu_custom_call.1
= control target key start
LH: loop header
LB: loop body
LE: loop exit
PB: predicated region body
PF: predicated region fallthrough
CT: control target
= control target key end

     0   :  { %s1066_s0 = inlined_call_operand.vmem [shape: f32[8,768], index: 0, kind: input, shape index: {}]   ;;  %s1067_s1 = inlined_call_operand.vmem [shape: f32[768,32], index: 1, kind: input, shape index: {}]   ;;  %s1068_s2 = inlined_call_operand.vmem [shape: f32[1,32], index: 2, kind: input, shape index: {}]   ;;  %s1069_s3 = inlined_call_operand.vmem [shape: f32[32,8], index: 3, kind: input, shape index: {}]   ;;  %s1070_s4 = inlined_call_operand.vmem [shape: f32[1,8], index: 4, kind: input, shape index: {}]   ;;  %s1071_s5 = inlined_call_operand.hbm [shape: f32[8,8], index: 5, kind: output, shape index: {}]  }
   0x1   :  { %v43_v0 = vld [vmem:[%s1067_s1 + $0x80] sm:$0xff]  ;;  %v44_v1 = vld [vmem:[%s1067_s1 + $0x88] sm:$0xff]  ;;  %v45_v11 = vld [vmem:[%s1067_s1 + $0x90] sm:$0xff] }
   0x2   :  { %v27_v2 = vld [vmem:[%s1067_s1] sm:$0xff]  ;;  %v566_v3 = vpack.c.bf16 %v44_v1, %v43_v0  ;;  %v28_v4 = vld [vmem:[%s1067_s1 + $0x8] sm:$0xff]  ;;  %v46_v13 = vld [vmem:[%s1067_s1 + $0x98] sm:$0xff] }
   0x3   :  { %v75_v5 = vld [vmem:[%s1067_s1 + $0x180] sm:$0xff]  ;;  %v76_v6 = vld [vmem:[%s1067_s1 + $0x188] sm:$0xff]  ;;  %v568_v7 = vpack.c.bf16 %v28_v4, %v27_v2  ;;  %v29_v14 = vld [vmem:[%s1067_s1 + $0x10] sm:$0xff]  ;;  %v570_v16 = vpack.c.bf16 %v46_v13, %v45_v11 }
   0x4   :  { %v598_v8 = vpack.c.bf16 %v76_v6, %v75_v5  ;;  %v59_v9 = vld [vmem:[%s1067_s1 + $0x100] sm:$0xff]  ;;  %v60_v10 = vld [vmem:[%s1067_s1 + $0x108] sm:$0xff]  ;;  %567 = vmatprep.subr.bf16.mxu0 %v566_v3  ;;  %v30_v15 = vld [vmem:[%s1067_s1 + $0x18] sm:$0xff] }
   0x5   :  { %v600_v12 = vpack.c.bf16 %v60_v10, %v59_v9  ;;  %569 = vmatpush3.bf16.msra.mxu0 %v568_v7  ;;  %v572_v17 = vpack.c.bf16 %v30_v15, %v29_v14  ;;  %v77_v18 = vld [vmem:[%s1067_s1 + $0x190] sm:$0xff]  ;;  %v78_v19 = vld [vmem:[%s1067_s1 + $0x198] sm:$0xff]  ;;  %v47_v23 = vld [vmem:[%s1067_s1 + $0xa0] sm:$0xff] }
   0x6   :  { %599 = vmatprep.subr.bf16.mxu1 %v598_v8  ;;  %v61_v20 = vld [vmem:[%s1067_s1 + $0x110] sm:$0xff]  ;;  %v602_v21 = vpack.c.bf16 %v78_v19, %v77_v18  ;;  %v62_v22 = vld [vmem:[%s1067_s1 + $0x118] sm:$0xff]  ;;  %v48_v24 = vld [vmem:[%s1067_s1 + $0xa8] sm:$0xff]  ;;  %571 = vmatprep.subr.bf16.mxu0 %v570_v16 }
   0x7   :  { %601 = vmatpush3.bf16.msra.mxu1 %v600_v12  ;;  %v604_v25 = vpack.c.bf16 %v62_v22, %v61_v20  ;;  %v574_v26 = vpack.c.bf16 %v48_v24, %v47_v23  ;;  %v31_v27 = vld [vmem:[%s1067_s1 + $0x20] sm:$0xff]  ;;  %v32_v28 = vld [vmem:[%s1067_s1 + $0x28] sm:$0xff]  ;;  %v49_v35 = vld [vmem:[%s1067_s1 + $0xb0] sm:$0xff] }
   0x8   :  { %v79_v29 = vld [vmem:[%s1067_s1 + $0x1a0] sm:$0xff]  ;;  %603 = vmatprep.subr.bf16.mxu1 %v602_v21  ;;  %v80_v30 = vld [vmem:[%s1067_s1 + $0x1a8] sm:$0xff]  ;;  %v576_v33 = vpack.c.bf16 %v32_v28, %v31_v27  ;;  %v50_v36 = vld [vmem:[%s1067_s1 + $0xb8] sm:$0xff] }
   0x9   :  { %v63_v31 = vld [vmem:[%s1067_s1 + $0x120] sm:$0xff]  ;;  %v64_v32 = vld [vmem:[%s1067_s1 + $0x128] sm:$0xff]  ;;  %573 = vmatpush3.bf16.msra.mxu0 %v572_v17  ;;  %v606_v34 = vpack.c.bf16 %v80_v30, %v79_v29  ;;  %v33_v37 = vld [vmem:[%s1067_s1 + $0x30] sm:$0xff]  ;;  %v578_v39 = vpack.c.bf16 %v50_v36, %v49_v35 }
   0xa   :  { %575 = vmatprep.subr.bf16.mxu0 %v574_v26  ;;  %v608_v38 = vpack.c.bf16 %v64_v32, %v63_v31  ;;  %v34_v40 = vld [vmem:[%s1067_s1 + $0x38] sm:$0xff]  ;;  %v81_v41 = vld [vmem:[%s1067_s1 + $0x1b0] sm:$0xff]  ;;  %v51_v46 = vld [vmem:[%s1067_s1 + $0xc0] sm:$0xff] }
   0xb   :  { %605 = vmatpush3.bf16.msra.mxu1 %v604_v25  ;;  %v82_v42 = vld [vmem:[%s1067_s1 + $0x1b8] sm:$0xff]  ;;  %v65_v44 = vld [vmem:[%s1067_s1 + $0x130] sm:$0xff]  ;;  %v52_v47 = vld [vmem:[%s1067_s1 + $0xc8] sm:$0xff]  ;;  %v580_v48 = vpack.c.bf16 %v34_v40, %v33_v37 }
   0xc   :  { %607 = vmatprep.subr.bf16.mxu1 %v606_v34  ;;  %v610_v43 = vpack.c.bf16 %v82_v42, %v81_v41  ;;  %v66_v45 = vld [vmem:[%s1067_s1 + $0x138] sm:$0xff]  ;;  %v83_v49 = vld [vmem:[%s1067_s1 + $0x1c0] sm:$0xff]  ;;  %v84_v50 = vld [vmem:[%s1067_s1 + $0x1c8] sm:$0xff]  ;;  %v582_v52 = vpack.c.bf16 %v52_v47, %v51_v46 }
   0xd   :  { %577 = vmatpush3.bf16.msra.mxu0 %v576_v33  ;;  %v612_v51 = vpack.c.bf16 %v66_v45, %v65_v44  ;;  %v35_v53 = vld [vmem:[%s1067_s1 + $0x40] sm:$0xff]  ;;  %v36_v54 = vld [vmem:[%s1067_s1 + $0x48] sm:$0xff]  ;;  %v614_v56 = vpack.c.bf16 %v84_v50, %v83_v49  ;;  %v53_v58 = vld [vmem:[%s1067_s1 + $0xd0] sm:$0xff] }
   0xe   :  { %579 = vmatprep.subr.bf16.mxu0 %v578_v39  ;;  %v67_v55 = vld [vmem:[%s1067_s1 + $0x140] sm:$0xff]  ;;  %v68_v57 = vld [vmem:[%s1067_s1 + $0x148] sm:$0xff]  ;;  %v54_v59 = vld [vmem:[%s1067_s1 + $0xd8] sm:$0xff]  ;;  %v584_v62 = vpack.c.bf16 %v36_v54, %v35_v53 }
   0xf   :  { %609 = vmatpush3.bf16.msra.mxu1 %v608_v38  ;;  %v85_v60 = vld [vmem:[%s1067_s1 + $0x1d0] sm:$0xff]  ;;  %v86_v61 = vld [vmem:[%s1067_s1 + $0x1d8] sm:$0xff]  ;;  %v616_v63 = vpack.c.bf16 %v68_v57, %v67_v55  ;;  %v586_v0 = vpack.c.bf16 %v54_v59, %v53_v58  ;;  %v55_v6 = vld [vmem:[%s1067_s1 + $0xe0] sm:$0xff] }
  0x10   :  { %611 = vmatprep.subr.bf16.mxu1 %v610_v43  ;;  %v37_v1 = vld [vmem:[%s1067_s1 + $0x50] sm:$0xff]  ;;  %v38_v2 = vld [vmem:[%s1067_s1 + $0x58] sm:$0xff]  ;;  %v618_v4 = vpack.c.bf16 %v86_v61, %v85_v60  ;;  %v56_v7 = vld [vmem:[%s1067_s1 + $0xe8] sm:$0xff] }
  0x11   :  { %581 = vmatpush3.bf16.msra.mxu0 %v580_v48  ;;  %v69_v3 = vld [vmem:[%s1067_s1 + $0x150] sm:$0xff]  ;;  %v70_v5 = vld [vmem:[%s1067_s1 + $0x158] sm:$0xff]  ;;  %v87_v8 = vld [vmem:[%s1067_s1 + $0x1e0] sm:$0xff]  ;;  %v588_v10 = vpack.c.bf16 %v38_v2, %v37_v1  ;;  %v590_v14 = vpack.c.bf16 %v56_v7, %v55_v6 }
  0x12   :  { %583 = vmatprep.subr.bf16.mxu0 %v582_v52  ;;  %v88_v9 = vld [vmem:[%s1067_s1 + $0x1e8] sm:$0xff]  ;;  %v39_v11 = vld [vmem:[%s1067_s1 + $0x60] sm:$0xff]  ;;  %v620_v13 = vpack.c.bf16 %v70_v5, %v69_v3  ;;  %v57_v19 = vld [vmem:[%s1067_s1 + $0xf0] sm:$0xff] }
  0x13   :  { %613 = vmatpush3.bf16.msra.mxu1 %v612_v51  ;;  %v22_v12 = vld [vmem:[%s1066_s0 + $0x8] sm:$0xff]  ;;  %v71_v16 = vld [vmem:[%s1067_s1 + $0x160] sm:$0xff]  ;;  %v622_v18 = vpack.c.bf16 %v88_v9, %v87_v8  ;;  %v58_v20 = vld [vmem:[%s1067_s1 + $0xf8] sm:$0xff] }
  0x14   :  { %615 = vmatprep.subr.bf16.mxu1 %v614_v56  ;;  %v40_v15 = vld [vmem:[%s1067_s1 + $0x68] sm:$0xff]  ;;  %194 = vmatprep.mubr.f32.mxu0 %v22_v12  ;;  %v24_v21 = vld [vmem:[%s1066_s0 + $0x18] sm:$0xff]  ;;  %v89_v22 = vld [vmem:[%s1067_s1 + $0x1f0] sm:$0xff]  ;;  %v594_v26 = vpack.c.bf16 %v58_v20, %v57_v19 }
  0x15   :  { %585 = vmatpush3.bf16.msra.mxu0 %v584_v62  ;;  %v72_v17 = vld [vmem:[%s1067_s1 + $0x168] sm:$0xff]  ;;  %v90_v23 = vld [vmem:[%s1067_s1 + $0x1f8] sm:$0xff]  ;;  %264 = vmatprep.mubr.f32.mxu1 %v24_v21  ;;  %v592_v24 = vpack.c.bf16 %v40_v15, %v39_v11  ;;  %v41_v27 = vld [vmem:[%s1067_s1 + $0x70] sm:$0xff] }
  0x16   :  { %587 = vmatprep.subr.bf16.mxu0 %v586_v0  ;;  %v624_v25 = vpack.c.bf16 %v72_v17, %v71_v16  ;;  %v42_v28 = vld [vmem:[%s1067_s1 + $0x78] sm:$0xff]  ;;  %v73_v29 = vld [vmem:[%s1067_s1 + $0x170] sm:$0xff]  ;;  %v626_v30 = vpack.c.bf16 %v90_v23, %v89_v22  ;;  %v107_v32 = vld [vmem:[%s1067_s1 + $0x280] sm:$0xff] }
  0x17   :  { %617 = vmatpush3.bf16.msra.mxu1 %v616_v63  ;;  %v74_v31 = vld [vmem:[%s1067_s1 + $0x178] sm:$0xff]  ;;  %v108_v33 = vld [vmem:[%s1067_s1 + $0x288] sm:$0xff]  ;;  %v596_v34 = vpack.c.bf16 %v42_v28, %v41_v27  ;;  %v91_v37 = vld [vmem:[%s1067_s1 + $0x200] sm:$0xff] }
  0x18   :  { %619 = vmatprep.subr.bf16.mxu1 %v618_v4  ;;  %v628_v35 = vpack.c.bf16 %v74_v31, %v73_v29  ;;  %v630_v36 = vpack.c.bf16 %v108_v33, %v107_v32  ;;  %v92_v38 = vld [vmem:[%s1067_s1 + $0x208] sm:$0xff]  ;;  %v109_v39 = vld [vmem:[%s1067_s1 + $0x290] sm:$0xff]  ;;  %v110_v40 = vld [vmem:[%s1067_s1 + $0x298] sm:$0xff] }
  0x19   :  { %589 = vmatpush3.bf16.msra.mxu0 %v588_v10  ;;  %v21_v41 = vld [vmem:[%s1066_s0] sm:$0xff]  ;;  %v632_v42 = vpack.c.bf16 %v92_v38, %v91_v37  ;;  %v23_v43 = vld [vmem:[%s1066_s0 + $0x10] sm:$0xff]  ;;  %v634_v44 = vpack.c.bf16 %v110_v40, %v109_v39  ;;  %v94_v46 = vld [vmem:[%s1067_s1 + $0x218] sm:$0xff] }
  0x1a   :  { %591 = vmatprep.subr.bf16.mxu0 %v590_v14  ;;  %v93_v45 = vld [vmem:[%s1067_s1 + $0x210] sm:$0xff]  ;;  %v111_v47 = vld [vmem:[%s1067_s1 + $0x2a0] sm:$0xff]  ;;  %v112_v48 = vld [vmem:[%s1067_s1 + $0x2a8] sm:$0xff] }
  0x1b   :  { %621 = vmatpush3.bf16.msra.mxu1 %v620_v13  ;;  %v26_v49 = vld [vmem:[%s1066_s0 + $0x28] sm:$0xff] }
  0x1c   :  { %623 = vmatprep.subr.bf16.mxu1 %v622_v18 }
  0x1d   :  { %593 = vmatpush3.bf16.msra.mxu0 %v592_v24 }
  0x1e   :  { %595 = vmatprep.subr.bf16.mxu0 %v594_v26 }
  0x1f   :  { %625 = vmatpush3.bf16.msra.mxu1 %v624_v25 }
  0x20   :  { %627 = vmatprep.subr.bf16.mxu1 %v626_v30 }
  0x21   :  { %597 = vmatpush3.bf16.msra.mxu0 %v596_v34 }
  0x22   :  { %631 = vmatprep.subr.bf16.mxu0 %v630_v36 }
  0x23   :  { %629 = vmatpush3.bf16.msra.mxu1 %v628_v35 }
  0x24   :  { %10 = vsyncpa [#allocation3], 0  ;;  %195 = vmatmul.mubr.f32.vlgmr.msra.gmra.mrb[0].mxu0 %v21_v41  ;;  %v636_v50 = vpack.c.bf16 %v94_v46, %v93_v45  ;;  %v638_v51 = vpack.c.bf16 %v112_v48, %v111_v47  ;;  %v95_v52 = vld [vmem:[%s1067_s1 + $0x220] sm:$0xff]  ;;  %v96_v53 = vld [vmem:[%s1067_s1 + $0x228] sm:$0xff]  ;;  %v696_v25 = vmov 0.0|0.0   ;;  %vm697_vm0 = vmmov 0  }
  0x25   :  { %633 = vmatpush3.bf16.msra.mxu0 %v632_v42  ;;  %334 = vmatprep.mubr.f32.mxu0 %v26_v49  ;;  %v113_v54 = vld [vmem:[%s1067_s1 + $0x2b0] sm:$0xff]  ;;  %v114_v55 = vld [vmem:[%s1067_s1 + $0x2b8] sm:$0xff]  ;;  %v640_v56 = vpack.c.bf16 %v96_v53, %v95_v52  ;;  %v115_v60 = vld [vmem:[%s1067_s1 + $0x2c0] sm:$0xff]  ;;  %v698_v29 = vmov 0.0   ;;  %vm352_vm1 = vcmask 261120   ;;  %s699_s6 = smov [#allocation2]  }
  0x26   :  { %265 = vmatmul.mubr.f32.vlgmr.msra.gmra.mrb[0].mxu1 %v23_v43  ;;  %635 = vmatprep.subr.bf16.mxu0 %v634_v44  ;;  %v642_v57 = vpack.c.bf16 %v114_v55, %v113_v54  ;;  %v97_v58 = vld [vmem:[%s1067_s1 + $0x230] sm:$0xff]  ;;  %v98_v59 = vld [vmem:[%s1067_s1 + $0x238] sm:$0xff]  ;;  %v116_v61 = vld [vmem:[%s1067_s1 + $0x2c8] sm:$0xff]  ;;  %vm426_vm2 = vcmask 64512  }
  0x27   :  { %v644_v62 = vpack.c.bf16 %v98_v59, %v97_v58  ;;  %v646_v63 = vpack.c.bf16 %v116_v61, %v115_v60  ;;  %v99_v0 = vld [vmem:[%s1067_s1 + $0x240] sm:$0xff]  ;;  %v100_v1 = vld [vmem:[%s1067_s1 + $0x248] sm:$0xff]  ;;  %v117_v2 = vld [vmem:[%s1067_s1 + $0x2d0] sm:$0xff]  ;;  %662 = vmatprep.subr.bf16.mxu1 %v696_v25  ;;  %563 = vmatprep.mubr.msk.f32.mxu1 %vm697_vm0, %v698_v29 }
  0x28   :  { %v118_v3 = vld [vmem:[%s1067_s1 + $0x2d8] sm:$0xff]  ;;  %v648_v4 = vpack.c.bf16 %v100_v1, %v99_v0  ;;  %v101_v6 = vld [vmem:[%s1067_s1 + $0x250] sm:$0xff]  ;;  %v119_v8 = vld [vmem:[%s1067_s1 + $0x2e0] sm:$0xff] }
  0x29   :  { %637 = vmatpush3.bf16.msra.mxu0 %v636_v50  ;;  %v650_v5 = vpack.c.bf16 %v118_v3, %v117_v2  ;;  %v102_v7 = vld [vmem:[%s1067_s1 + $0x258] sm:$0xff]  ;;  %v120_v9 = vld [vmem:[%s1067_s1 + $0x2e8] sm:$0xff]  ;;  %v103_v12 = vld [vmem:[%s1067_s1 + $0x260] sm:$0xff] }
  0x2a   :  { %639 = vmatprep.subr.bf16.mxu0 %v638_v51  ;;  %v652_v10 = vpack.c.bf16 %v102_v7, %v101_v6  ;;  %v654_v11 = vpack.c.bf16 %v120_v9, %v119_v8  ;;  %v104_v13 = vld [vmem:[%s1067_s1 + $0x268] sm:$0xff]  ;;  %v121_v14 = vld [vmem:[%s1067_s1 + $0x2f0] sm:$0xff]  ;;  %v122_v15 = vld [vmem:[%s1067_s1 + $0x2f8] sm:$0xff] }
  0x2b   :  { %v656_v16 = vpack.c.bf16 %v104_v13, %v103_v12  ;;  %v658_v17 = vpack.c.bf16 %v122_v15, %v121_v14  ;;  %v105_v18 = vld [vmem:[%s1067_s1 + $0x270] sm:$0xff]  ;;  %v106_v19 = vld [vmem:[%s1067_s1 + $0x278] sm:$0xff]  ;;  %v25_v21 = vld [vmem:[%s1066_s0 + $0x20] sm:$0xff] }
  0x2c   :  { %v660_v20 = vpack.c.bf16 %v106_v19, %v105_v18  ;;  %v341_v22 = vld [vmem:[%s1069_s3] sm:$0xff]  ;;  %v342_v23 = vld [vmem:[%s1069_s3 + $0x8] sm:$0xff]  ;;  %v343_v26 = vld [vmem:[%s1069_s3 + $0x10] sm:$0xff] }
  0x2d   :  { %641 = vmatpush3.bf16.msra.mxu0 %v640_v56  ;;  %v663_v24 = vpack.c.bf16 %v342_v23, %v341_v22  ;;  %v344_v27 = vld [vmem:[%s1069_s3 + $0x18] sm:$0xff]  ;;  %v442_v31 = vld [vmem:[%s1068_s2] ss:$0 sm:$0xff]  ;;  %s434_s2 = sshll.u32 %s699_s6, 4  ;;  %s435_s2 = int_to_ptr.vmem [resolvable:$true] %s434_s2 }
  0x2e   :  { %643 = vmatprep.subr.bf16.mxu0 %v642_v57  ;;  %v666_v28 = vpack.c.bf16 %v344_v27, %v343_v26  ;;  %v443_v44 = vld [vmem:[%s1070_s4] ss:$0 sm:$0xff]  ;;  %s672_s7 = scalar_lea.vmem %s435_s2, 128  ;;  %p677_p1 = scmp.lt.s32.totalorder %s435_s2, %s435_s2 }
  0x2f   :  { %664 = vmatpush3.bf16.msra.mxu1 %v663_v24  ;;  %p673_p0 = scmp.ne.s32.totalorder %s435_s2, %s672_s7  ;;  %p678_p2 = scmp.lt.s32.totalorder %s672_s7, %s672_s7 }
  0x30   :  { %665 = vmatprep.subr.bf16.mxu1 %v696_v25 }
  0x31   :  { %645 = vmatpush3.bf16.msra.mxu0 %v644_v62  ;;  %p679_p3 = por %p678_p2, %p677_p1 }
  0x32   :  { %647 = vmatprep.subr.bf16.mxu0 %v646_v63 }
  0x33   :  { %667 = vmatpush3.bf16.msra.mxu1 %v666_v28  ;;  %p680_p4 = pnand %p679_p3, %p673_p0 }
  0x35   :  { %649 = vmatpush3.bf16.msra.mxu0 %v648_v4 }
  0x36   :  { %651 = vmatprep.subr.bf16.mxu0 %v650_v5 }
  0x39   :  { %653 = vmatpush3.bf16.msra.mxu0 %v652_v10 }
  0x3a   :  { %655 = vmatprep.subr.bf16.mxu0 %v654_v11 }
  0x3d   :  { %657 = vmatpush3.bf16.msra.mxu0 %v656_v16 }
  0x3e   :  { %659 = vmatprep.subr.bf16.mxu0 %v658_v17 }
  0x41   :  { %661 = vmatpush3.bf16.msra.mxu0 %v660_v20 }
  0x44   :  { %335 = vmatmul.mubr.f32.vlgmr.msra.gmra.mrb[2].mxu0 %v25_v21 }
  0xf7   :  { %v477_v30 = vpop.f32.mrb[0].mxu0 }
  0xf8   :  { %v478_v32 = vpop.f32.mrb[1].mxu0 }
  0xf9   :  { %v512_v33 = vpop.f32.mrb[0].mxu1  ;;  %v479_v34 = vadd.f32 %v478_v32, %v477_v30 }
  0xfa   :  { %v513_v35 = vpop.f32.mrb[1].mxu1 }
  0xfb   :  { %v514_v36 = vadd.f32 %v513_v35, %v512_v33  ;;  %v197_v37 = vadd.f32 %v479_v34, %v442_v31 }
  0xfd   :  { %v267_v38 = vadd.f32 %v514_v36, %v197_v37 }
 0x117   :  { %v547_v39 = vpop.f32.mrb[2].mxu0 }
 0x118   :  { %v548_v40 = vpop.f32.mrb[3].mxu0 }
 0x119   :  { %v549_v41 = vadd.f32 %v548_v40, %v547_v39 }
 0x11b   :  { %v337_v42 = vadd.f32 %v549_v41, %v267_v38 }
 0x11d   :  { %v340_v43 = vmax.f32 %v337_v42, 0.0 }
 0x11f   :  { %564 = vmatmul.mubr.msk.f32.vlgmr.msra.gmra.mrb[2].mxu1 %vm352_vm1, %v340_v43 }
 0x1f2   :  { %v422_v45 = vpop.f32.mrb[2].mxu1 }
 0x1f3   :  { %v423_v46 = vadd.f32 %v443_v44, %v422_v45  ;;  %v565_v47 = vpop.f32.mrb[3].mxu1 }
 0x1f5   :  { %427 = vst.msk [vmem:[#allocation2] sm:$0xff] %vm426_vm2, %v423_v46 }
 0x1f6   :  { %683 = shalt.err (!%p680_p4)
}
 0x1f7   :  { %s684_s10 = scalar_lea.hbm %s1071_s5, 128 }
 0x1f8   :  { %p685_p5 = scmp.ne.s32.totalorder %s1071_s5, %s684_s10  ;;  %p688_p6 = scmp.lt.u32.totalorder %s684_s10, %s1071_s5 }
 0x1fa   :  { %p690_p7 = pnand %p688_p6, %p685_p5 }
 0x1fc   :  { %693 = shalt.err (!%p690_p7)
}
 0x1fd   :  { %437 = dma.vmem_to_hbm [thread:$0]  %s435_s2, 128, %s1071_s5, [#allocation3]  }
 0x1fe   :  { %694 = dma.done.wait [#allocation3], 128  }
 0x1ff   :  { %695 = vsyncadd [#allocation3], 4294967168 }
 0x200   :  { %441 = vsyncpa [#allocation3], 1 }

</bundles_post_ra>
